<compile_context>
chip_gen: v7x
topology: tpu7x:2x2x1
jax: 0.10.0
libtpu: 0.0.40
codegen_flags: <defaults>
</compile_context>

<pallas_src>
import functools

import jax
import jax.numpy as jnp
from jax.experimental import pallas as pl
from jax.experimental.pallas import tpu as pltpu


def _round_up(x, m):
    return ((x + m - 1) // m) * m


def _vmem_limit(need_bytes):
    return int(min(max(2 * need_bytes + (1 << 20), 16 << 20), 64 << 20))


# ------------------------- Fused whole-stack kernel ------------------------- #

def _gcn_stack_kernel(*refs, dims):
    """Fused GCN stack: every layer runs inside one kernel invocation.

    refs = (a_ref, x_ref, w0, b0, w1, b1, ..., o_ref)
      a_ref : [Np, Np]           normalized adjacency (bf16, zero-padded)
      x_ref : [Np, Fp0]          node features        (bf16, zero-padded)
      w_l   : [Fp_in_l, Fp_out_l] layer weight         (bf16, zero-padded)
      b_l   : [1, Fp_out_l]      layer bias           (f32,  zero-padded)
      o_ref : [Np, Fp_last]      output (bf16); wrapper slices [:N, :classes]

    The intermediate h stays resident in VMEM/vregs across layers.
    """
    num_layers = len(dims) - 1
    a_ref, x_ref, o_ref = refs[0], refs[1], refs[-1]
    a = a_ref[...]                       # bf16 [Np, Np]
    h = x_ref[...]                       # bf16 [Np, Fp0]
    out = None
    # Static unroll: per-layer padded lane widths differ in general, so shapes
    # are non-uniform and lax.fori_loop cannot carry them. Fine at 128-wide
    # tiles; split layers onto a grid axis if feature widths grow a lot.
    for li in range(num_layers):
        w = refs[2 + 2 * li][...]        # bf16 [Fp_in, Fp_out]
        b = refs[3 + 2 * li][...]        # f32  [1, Fp_out]
        f_in, f_out = dims[li], dims[li + 1]
        # Cheaper matmul order per layer (A@H first when F_in < F_out).
        if f_in < f_out:
            ah = jnp.dot(a, h, preferred_element_type=jnp.float32)
            hf = jnp.dot(ah.astype(jnp.bfloat16), w,
                         preferred_element_type=jnp.float32)
        else:
            hw = jnp.dot(h, w, preferred_element_type=jnp.float32)
            hf = jnp.dot(a, hw.astype(jnp.bfloat16),
                         preferred_element_type=jnp.float32)
        hf = hf + b
        if li < num_layers - 1:
            hf = jnp.maximum(hf, 0.0)    # ReLU
            # TODO(synk): Dropout(0.5) between hidden layers is identity in
            # eval mode; training-mode dropout would need pltpu.prng_random_bits.
            h = hf.astype(jnp.bfloat16)
        out = hf
    o_ref[...] = out.astype(o_ref.dtype)


def gcn_stack_fused(a_pad, x_pad, ws, bs, dims):
    """Single fused pallas_call for the whole stack (everything fits VMEM)."""
    np_ = a_pad.shape[0]
    fp_out = ws[-1].shape[1]
    operands = [a_pad, x_pad]
    for w, b in zip(ws, bs):
        operands += [w, b]

    need = (sum(op.size * op.dtype.itemsize for op in operands)
            + np_ * fp_out * 2)
    flops = sum(2 * (np_ * np_ * w.shape[0] + np_ * w.shape[0] * w.shape[1])
                for w in ws)

    in_specs = [pl.BlockSpec(op.shape, lambda i: (0,) * op.ndim)
                for op in operands]

    return pl.pallas_call(
        functools.partial(_gcn_stack_kernel, dims=tuple(dims)),
        out_shape=jax.ShapeDtypeStruct((np_, fp_out), jnp.bfloat16),
        grid=(1,),
        in_specs=in_specs,
        out_specs=pl.BlockSpec((np_, fp_out), lambda i: (0, 0)),
        compiler_params=pltpu.CompilerParams(
            dimension_semantics=("arbitrary",),
            vmem_limit_bytes=_vmem_limit(need)),
        cost_estimate=pl.CostEstimate(
            flops=flops, transcendentals=0, bytes_accessed=need),
    )(*operands)


# --------------------- Row-tiled per-layer kernel (large N) ----------------- #

def _gcn_layer_kernel(a_ref, h_ref, w_ref, b_ref, o_ref, *, relu):
    """One row panel of one GCN layer: o = [relu](A_rows @ H @ W + b)."""
    ah = jnp.dot(a_ref[...], h_ref[...], preferred_element_type=jnp.float32)
    hf = jnp.dot(ah.astype(jnp.bfloat16), w_ref[...],
                 preferred_element_type=jnp.float32)
    hf = hf + b_ref[...]
    if relu:
        hf = jnp.maximum(hf, 0.0)
    o_ref[...] = hf.astype(o_ref.dtype)


def gcn_layer_tiled(a_pad, h, w, b, *, relu, tm=128):
    """One GCN layer with A / output row-tiled on a 'parallel' grid axis.

    A row panels are double-buffered by the BlockSpec pipeline; H and W stay
    fully resident in VMEM. Splitting rows lets v7x use both TensorCores and
    keeps the footprint under its 64 MiB VMEM as N grows.
    """
    np_ = a_pad.shape[0]
    f_in, f_out = w.shape
    need = (2 * tm * np_ * 2            # double-buffered A row panels (bf16)
            + np_ * f_in * 2 + f_in * f_out * 2 + f_out * 4
            + 2 * tm * f_out * 2)       # double-buffered output panels (bf16)
    return pl.pallas_call(
        functools.partial(_gcn_layer_kernel, relu=relu),
        out_shape=jax.ShapeDtypeStruct((np_, f_out), jnp.bfloat16),
        grid=(np_ // tm,),
        in_specs=[
            pl.BlockSpec((tm, np_), lambda i: (i, 0)),      # stream A rows
            pl.BlockSpec((np_, f_in), lambda i: (0, 0)),    # H resident
            pl.BlockSpec((f_in, f_out), lambda i: (0, 0)),  # W resident
            pl.BlockSpec((1, f_out), lambda i: (0, 0)),     # bias
        ],
        out_specs=pl.BlockSpec((tm, f_out), lambda i: (i, 0)),
        compiler_params=pltpu.CompilerParams(
            dimension_semantics=("parallel",),
            vmem_limit_bytes=_vmem_limit(need)),
    )(a_pad, h, w, b)


# ------------------------------- Glue (JAX) -------------------------------- #

def build_normalized_adjacency(edge_index, num_nodes):
    """Dense  D^{-1/2} (A + I) D^{-1/2}  from an edge_index [2, E] (int32)."""
    src, dst = edge_index[0], edge_index[1]
    adj = jnp.zeros((num_nodes, num_nodes), jnp.float32)
    # GCNConv scatter-adds messages from src -> dst (duplicate edges accumulate).
    adj = adj.at[dst, src].add(1.0)
    adj = adj + jnp.eye(num_nodes, dtype=jnp.float32)         # self loops
    deg = jnp.sum(adj, axis=1)
    d_inv_sqrt = jnp.where(deg > 0, 1.0 / jnp.sqrt(deg), 0.0)
    return d_inv_sqrt[:, None] * adj * d_inv_sqrt[None, :]


def glorot(key, shape):
    fan_in, fan_out = shape
    limit = jnp.sqrt(6.0 / (fan_in + fan_out))
    return jax.random.uniform(key, shape, jnp.float32, -limit, limit)


def init_gcn_params(key, feature, hidden, classes):
    dims = [feature] + list(hidden) + [classes]
    params = []
    for i in range(len(dims) - 1):
        key, wk = jax.random.split(key)
        w = glorot(wk, (dims[i], dims[i + 1]))
        b = jnp.zeros((dims[i + 1],), jnp.float32)            # GCNConv bias init = 0
        params.append((w, b))
    return params, dims


def pack_gcn(a_norm, params, dims):
    """One-time preprocessing: pad adjacency / per-layer pad weights to 128 lanes."""
    n = a_norm.shape[0]
    np_ = _round_up(n, 128)
    a_pad = jnp.zeros((np_, np_), jnp.bfloat16).at[:n, :n].set(
        a_norm.astype(jnp.bfloat16))
    ws, bs = [], []
    for li, (w, b) in enumerate(params):
        fin_p = _round_up(dims[li], 128)
        fout_p = _round_up(dims[li + 1], 128)
        wp = jnp.zeros((fin_p, fout_p), jnp.bfloat16)
        wp = wp.at[:w.shape[0], :w.shape[1]].set(w.astype(jnp.bfloat16))
        bp = jnp.zeros((1, fout_p), jnp.float32).at[0, :b.shape[0]].set(b)
        ws.append(wp)
        bs.append(bp)
    return a_pad, tuple(ws), tuple(bs), np_


@functools.partial(jax.jit, static_argnames=("dims", "n", "layered"))
def gcn_forward(x, a_pad, ws, bs, *, dims, n, layered=False):
    """Mirrors GCN.forward: [GCNConv -> ReLU -> Dropout]* -> GCNConv (eval mode)."""
    np_ = a_pad.shape[0]
    fin_p = ws[0].shape[0]
    x_pad = jnp.zeros((np_, fin_p), jnp.bfloat16).at[:n, :x.shape[1]].set(
        x.astype(jnp.bfloat16))

    fused_bytes = (a_pad.size * 2 + x_pad.size * 2
                   + sum(w.size * 2 for w in ws) + sum(b.size * 4 for b in bs))
    if (not layered) and np_ <= 1024 and fused_bytes <= (20 << 20):
        # Small graph: one fused call, h never leaves VMEM.
        out_pad = gcn_stack_fused(a_pad, x_pad, ws, bs, dims)
    else:
        # Larger graph: per-layer calls, A row-tiled on a 'parallel' grid axis.
        h = x_pad
        for li, (w, b) in enumerate(zip(ws, bs)):
            h = gcn_layer_tiled(a_pad, h, w, b, relu=(li < len(ws) - 1))
        out_pad = h
    return out_pad[:n, :dims[-1]].astype(jnp.float32)


def gcn_reference(x, a_norm, params):
    """Pure-JAX f32 reference (eval mode)."""
    h = x
    for li, (w, b) in enumerate(params):
        h = a_norm @ (h @ w) + b[None, :]
        if li < len(params) - 1:
            h = jnp.maximum(h, 0.0)
    return h


# --------------------------------- Main ------------------------------------ #

if __name__ == "__main__":
    FEATURE = 16
    HIDDEN = [32, 32]
    CLASSES = 8

    key = jax.random.PRNGKey(0)
    key, pk = jax.random.split(key)
    params, dims = init_gcn_params(pk, FEATURE, HIDDEN, CLASSES)

    def make_graph(n, xk):
        x = jax.random.normal(xk, (n, FEATURE), jnp.float32)
        idx = jnp.arange(n, dtype=jnp.int32)
        nxt = (idx + 1) % n
        edge_index = jnp.stack(
            [jnp.concatenate([idx, nxt]), jnp.concatenate([nxt, idx])], axis=0)
        return x, edge_index

    # (N=32, fused single-call path) and (N=200, row-tiled 'parallel' path)
    for n, layered in ((32, False), (200, True)):
        key, xk = jax.random.split(key)
        x, edge_index = make_graph(n, xk)
        a_norm = build_normalized_adjacency(edge_index, n)
        a_pad, ws, bs, np_ = pack_gcn(a_norm, params, dims)

        out = gcn_forward(x, a_pad, ws, bs, dims=tuple(dims), n=n,
                          layered=layered)
        out = jax.block_until_ready(out)

        assert out.shape == (n, CLASSES), out.shape
        assert bool(jnp.all(jnp.isfinite(out)))
        ref = gcn_reference(x, a_norm, params)
        err = float(jnp.max(jnp.abs(out - ref)))
        # bf16 operands (f32 accumulation) vs. an f32 reference: loose tolerance.
        assert err < 0.25, err

    print("KERNEL_OK")
</pallas_src>

<mosaic_0001>
module attributes {stable_mosaic.version = 11 : i64} {
  func.func @_gcn_stack_kernel(%arg0: i32, %arg1: memref<128x128xbf16, #tpu.memory_space<vmem>>, %arg2: memref<128x128xbf16, #tpu.memory_space<vmem>>, %arg3: memref<128x128xbf16, #tpu.memory_space<vmem>>, %arg4: memref<1x128xf32, #tpu.memory_space<vmem>>, %arg5: memref<128x128xbf16, #tpu.memory_space<vmem>>, %arg6: memref<1x128xf32, #tpu.memory_space<vmem>>, %arg7: memref<128x128xbf16, #tpu.memory_space<vmem>>, %arg8: memref<1x128xf32, #tpu.memory_space<vmem>>, %arg9: memref<128x128xbf16, #tpu.memory_space<vmem>>) attributes {dimension_semantics = [#tpu.dimension_semantics<arbitrary>], iteration_bounds = array<i64: 1>, scalar_prefetch = 0 : i64, scratch_operands = 0 : i64, tpu.core_type = #tpu.core_type<tc>, window_params = [{pipeline_mode = #tpu.pipeline_mode<synchronous>, transform_indices = @transform_0, window_bounds = array<i64: 128, 128>}, {pipeline_mode = #tpu.pipeline_mode<synchronous>, transform_indices = @transform_1, window_bounds = array<i64: 128, 128>}, {pipeline_mode = #tpu.pipeline_mode<synchronous>, transform_indices = @transform_2, window_bounds = array<i64: 128, 128>}, {pipeline_mode = #tpu.pipeline_mode<synchronous>, transform_indices = @transform_3, window_bounds = array<i64: 1, 128>}, {pipeline_mode = #tpu.pipeline_mode<synchronous>, transform_indices = @transform_4, window_bounds = array<i64: 128, 128>}, {pipeline_mode = #tpu.pipeline_mode<synchronous>, transform_indices = @transform_5, window_bounds = array<i64: 1, 128>}, {pipeline_mode = #tpu.pipeline_mode<synchronous>, transform_indices = @transform_6, window_bounds = array<i64: 128, 128>}, {pipeline_mode = #tpu.pipeline_mode<synchronous>, transform_indices = @transform_7, window_bounds = array<i64: 1, 128>}, {pipeline_mode = #tpu.pipeline_mode<synchronous>, transform_indices = @transform_8, window_bounds = array<i64: 128, 128>}]} {
    %c0 = arith.constant 0 : index
    %c0_0 = arith.constant 0 : index
    %0 = vector.load %arg1[%c0, %c0_0] : memref<128x128xbf16, #tpu.memory_space<vmem>>, vector<128x128xbf16>
    %c0_1 = arith.constant 0 : index
    %c0_2 = arith.constant 0 : index
    %1 = vector.load %arg2[%c0_1, %c0_2] : memref<128x128xbf16, #tpu.memory_space<vmem>>, vector<128x128xbf16>
    %c0_3 = arith.constant 0 : index
    %c0_4 = arith.constant 0 : index
    %2 = vector.load %arg3[%c0_3, %c0_4] : memref<128x128xbf16, #tpu.memory_space<vmem>>, vector<128x128xbf16>
    %c0_5 = arith.constant 0 : index
    %c0_6 = arith.constant 0 : index
    %3 = vector.load %arg4[%c0_5, %c0_6] : memref<1x128xf32, #tpu.memory_space<vmem>>, vector<1x128xf32>
    %cst = arith.constant dense<0.000000e+00> : vector<128x128xf32>
    %4 = tpu.matmul %0, %1, %cst {dimension_numbers = #tpu.dot_dimension_numbers<[1], [0], [0], [1], [0, 0, 1, 1], [], []>} : vector<128x128xbf16>, vector<128x128xbf16>, vector<128x128xf32> -> vector<128x128xf32>
    %5 = arith.truncf %4 : vector<128x128xf32> to vector<128x128xbf16>
    %cst_7 = arith.constant dense<0.000000e+00> : vector<128x128xf32>
    %6 = tpu.matmul %5, %2, %cst_7 {dimension_numbers = #tpu.dot_dimension_numbers<[1], [0], [0], [1], [0, 0, 1, 1], [], []>} : vector<128x128xbf16>, vector<128x128xbf16>, vector<128x128xf32> -> vector<128x128xf32>
    %7 = vector.broadcast %3 : vector<1x128xf32> to vector<128x128xf32>
    %8 = arith.addf %6, %7 : vector<128x128xf32>
    %cst_8 = arith.constant 0.000000e+00 : f32
    %9 = vector.broadcast %cst_8 : f32 to vector<128x128xf32>
    %10 = arith.maximumf %8, %9 : vector<128x128xf32>
    %11 = arith.truncf %10 : vector<128x128xf32> to vector<128x128xbf16>
    %c0_9 = arith.constant 0 : index
    %c0_10 = arith.constant 0 : index
    %12 = vector.load %arg5[%c0_9, %c0_10] : memref<128x128xbf16, #tpu.memory_space<vmem>>, vector<128x128xbf16>
    %c0_11 = arith.constant 0 : index
    %c0_12 = arith.constant 0 : index
    %13 = vector.load %arg6[%c0_11, %c0_12] : memref<1x128xf32, #tpu.memory_space<vmem>>, vector<1x128xf32>
    %cst_13 = arith.constant dense<0.000000e+00> : vector<128x128xf32>
    %14 = tpu.matmul %11, %12, %cst_13 {dimension_numbers = #tpu.dot_dimension_numbers<[1], [0], [0], [1], [0, 0, 1, 1], [], []>} : vector<128x128xbf16>, vector<128x128xbf16>, vector<128x128xf32> -> vector<128x128xf32>
    %15 = arith.truncf %14 : vector<128x128xf32> to vector<128x128xbf16>
    %cst_14 = arith.constant dense<0.000000e+00> : vector<128x128xf32>
    %16 = tpu.matmul %0, %15, %cst_14 {dimension_numbers = #tpu.dot_dimension_numbers<[1], [0], [0], [1], [0, 0, 1, 1], [], []>} : vector<128x128xbf16>, vector<128x128xbf16>, vector<128x128xf32> -> vector<128x128xf32>
    %17 = vector.broadcast %13 : vector<1x128xf32> to vector<128x128xf32>
    %18 = arith.addf %16, %17 : vector<128x128xf32>
    %cst_15 = arith.constant 0.000000e+00 : f32
    %19 = vector.broadcast %cst_15 : f32 to vector<128x128xf32>
    %20 = arith.maximumf %18, %19 : vector<128x128xf32>
    %21 = arith.truncf %20 : vector<128x128xf32> to vector<128x128xbf16>
    %c0_16 = arith.constant 0 : index
    %c0_17 = arith.constant 0 : index
    %22 = vector.load %arg7[%c0_16, %c0_17] : memref<128x128xbf16, #tpu.memory_space<vmem>>, vector<128x128xbf16>
    %c0_18 = arith.constant 0 : index
    %c0_19 = arith.constant 0 : index
    %23 = vector.load %arg8[%c0_18, %c0_19] : memref<1x128xf32, #tpu.memory_space<vmem>>, vector<1x128xf32>
    %cst_20 = arith.constant dense<0.000000e+00> : vector<128x128xf32>
    %24 = tpu.matmul %21, %22, %cst_20 {dimension_numbers = #tpu.dot_dimension_numbers<[1], [0], [0], [1], [0, 0, 1, 1], [], []>} : vector<128x128xbf16>, vector<128x128xbf16>, vector<128x128xf32> -> vector<128x128xf32>
    %25 = arith.truncf %24 : vector<128x128xf32> to vector<128x128xbf16>
    %cst_21 = arith.constant dense<0.000000e+00> : vector<128x128xf32>
    %26 = tpu.matmul %0, %25, %cst_21 {dimension_numbers = #tpu.dot_dimension_numbers<[1], [0], [0], [1], [0, 0, 1, 1], [], []>} : vector<128x128xbf16>, vector<128x128xbf16>, vector<128x128xf32> -> vector<128x128xf32>
    %27 = vector.broadcast %23 : vector<1x128xf32> to vector<128x128xf32>
    %28 = arith.addf %26, %27 : vector<128x128xf32>
    %29 = arith.truncf %28 : vector<128x128xf32> to vector<128x128xbf16>
    %c0_22 = arith.constant 0 : index
    %c0_23 = arith.constant 0 : index
    %30 = vector.load %arg9[%c0_22, %c0_23] : memref<128x128xbf16, #tpu.memory_space<vmem>>, vector<128x128xbf16>
    tpu.vector_store %arg9[%c0_22, %c0_23], %29 {strides = array<i32>} : memref<128x128xbf16, #tpu.memory_space<vmem>>, vector<128x128xbf16>,
    return
  }
  func.func @transform_0(%arg0: i32) -> (i32, i32) {
    %c0_i32 = arith.constant 0 : i32
    %c0_i32_0 = arith.constant 0 : i32
    %c0_i32_1 = arith.constant 0 : i32
    return %c0_i32, %c0_i32_0 : i32, i32
  }
  func.func @transform_1(%arg0: i32) -> (i32, i32) {
    %c0_i32 = arith.constant 0 : i32
    %c0_i32_0 = arith.constant 0 : i32
    %c0_i32_1 = arith.constant 0 : i32
    return %c0_i32, %c0_i32_0 : i32, i32
  }
  func.func @transform_2(%arg0: i32) -> (i32, i32) {
    %c0_i32 = arith.constant 0 : i32
    %c0_i32_0 = arith.constant 0 : i32
    %c0_i32_1 = arith.constant 0 : i32
    return %c0_i32, %c0_i32_0 : i32, i32
  }
  func.func @transform_3(%arg0: i32) -> (i32, i32) {
    %c0_i32 = arith.constant 0 : i32
    %c0_i32_0 = arith.constant 0 : i32
    %c0_i32_1 = arith.constant 0 : i32
    return %c0_i32, %c0_i32_0 : i32, i32
  }
  func.func @transform_4(%arg0: i32) -> (i32, i32) {
    %c0_i32 = arith.constant 0 : i32
    %c0_i32_0 = arith.constant 0 : i32
    %c0_i32_1 = arith.constant 0 : i32
    return %c0_i32, %c0_i32_0 : i32, i32
  }
  func.func @transform_5(%arg0: i32) -> (i32, i32) {
    %c0_i32 = arith.constant 0 : i32
    %c0_i32_0 = arith.constant 0 : i32
    %c0_i32_1 = arith.constant 0 : i32
    return %c0_i32, %c0_i32_0 : i32, i32
  }
  func.func @transform_6(%arg0: i32) -> (i32, i32) {
    %c0_i32 = arith.constant 0 : i32
    %c0_i32_0 = arith.constant 0 : i32
    %c0_i32_1 = arith.constant 0 : i32
    return %c0_i32, %c0_i32_0 : i32, i32
  }
  func.func @transform_7(%arg0: i32) -> (i32, i32) {
    %c0_i32 = arith.constant 0 : i32
    %c0_i32_0 = arith.constant 0 : i32
    %c0_i32_1 = arith.constant 0 : i32
    return %c0_i32, %c0_i32_0 : i32, i32
  }
  func.func @transform_8(%arg0: i32) -> (i32, i32) {
    %c0_i32 = arith.constant 0 : i32
    %c0_i32_0 = arith.constant 0 : i32
    %c0_i32_1 = arith.constant 0 : i32
    return %c0_i32, %c0_i32_0 : i32, i32
  }
}

</mosaic_0001>

<bundles_post_ra>
// kernel: gcn_forward.1
= control target key start
LH: loop header
LB: loop body
LE: loop exit
PB: predicated region body
PF: predicated region fallthrough
CT: control target
= control target key end

     0   :  { %13 = vsyncpa [#allocation3], 0  ;;  %s1859_s0 = inlined_call_operand.vmem [shape: bf16[128,128], index: 0, kind: input, shape index: {}]   ;;  %s1860_s1 = inlined_call_operand.vmem [shape: bf16[128,128], index: 1, kind: input, shape index: {}]   ;;  %s1861_s2 = inlined_call_operand.vmem [shape: bf16[128,128], index: 2, kind: input, shape index: {}]   ;;  %s1862_s3 = inlined_call_operand.vmem [shape: f32[1,128], index: 3, kind: input, shape index: {}]   ;;  %s1863_s4 = inlined_call_operand.hbm [shape: bf16[128,128], index: 4, kind: input, shape index: {}]   ;;  %s1864_s5 = inlined_call_operand.vmem [shape: f32[1,128], index: 5, kind: input, shape index: {}]   ;;  %s1865_s6 = inlined_call_operand.hbm [shape: bf16[128,128], index: 6, kind: input, shape index: {}]   ;;  %s1866_s7 = inlined_call_operand.vmem [shape: f32[1,128], index: 7, kind: input, shape index: {}]   ;;  %s1867_s8 = inlined_call_operand.vmem [shape: bf16[128,128], index: 8, kind: output, shape index: {}]  }
   0x1   :  { %14 = vsyncpa [#allocation5], 0  ;;  %s1641_s27 = smov [#allocation2]   ;;  %s1593_s9 = scalar_lea.hbm %s1863_s4, 1024 }
   0x2   :  { %s28_s28 = sshll.u32 %s1641_s27, 4  ;;  %p1594_p0 = scmp.ne.s32.totalorder %s1863_s4, %s1593_s9  ;;  %s29_s28 = int_to_ptr.vmem [resolvable:$true] %s28_s28 }
   0x3   :  { %p1597_p1 = scmp.lt.u32.totalorder %s1593_s9, %s1863_s4 }
   0x5   :  { %p1599_p2 = pnand %p1597_p1, %p1594_p0 }
   0x7   :  { %1602 = shalt.err (!%p1599_p2)
}
   0x8   :  { %s1603_s14 = scalar_lea.vmem %s29_s28, 1024  ;;  %p1608_p4 = scmp.lt.s32.totalorder %s29_s28, %s29_s28 }
   0x9   :  { %p1604_p3 = scmp.ne.s32.totalorder %s29_s28, %s1603_s14  ;;  %p1609_p5 = scmp.lt.s32.totalorder %s1603_s14, %s1603_s14 }
   0xb   :  { %p1610_p6 = por %p1609_p5, %p1608_p4 }
   0xd   :  { %p1611_p7 = pnand %p1610_p6, %p1604_p3 }
   0xf   :  { %1614 = shalt.err (!%p1611_p7)
}
  0x10   :  { %s1642_s15 = smov 64   ;;  %s1643_s16 = smov 4  }
  0x11   :  { %34 = dma.hbm_to_vmem [thread:$0]  %s1863_s4, 1024, %s29_s28, [#allocation3], %s1642_s15, %s1642_s15, %s1643_s16  }
  0x12   :  { %s1644_s19 = smov [#allocation4]   ;;  %s1615_s23 = scalar_lea.hbm %s1865_s6, 1024 }
  0x13   :  { %s42_s20 = sshll.u32 %s1644_s19, 4  ;;  %p1616_p8 = scmp.ne.s32.totalorder %s1865_s6, %s1615_s23  ;;  %s43_s20 = int_to_ptr.vmem [resolvable:$true] %s42_s20 }
  0x14   :  { %p1619_p9 = scmp.lt.u32.totalorder %s1615_s23, %s1865_s6 }
  0x16   :  { %p1621_p10 = pnand %p1619_p9, %p1616_p8 }
  0x18   :  { %1624 = shalt.err (!%p1621_p10)
}
  0x19   :  { %s1625_s29 = scalar_lea.vmem %s43_s20, 1024  ;;  %p1630_p12 = scmp.lt.s32.totalorder %s43_s20, %s43_s20 }
  0x1a   :  { %p1626_p11 = scmp.ne.s32.totalorder %s43_s20, %s1625_s29  ;;  %p1631_p13 = scmp.lt.s32.totalorder %s1625_s29, %s1625_s29 }
  0x1c   :  { %p1632_p0 = por %p1631_p13, %p1630_p12 }
  0x1e   :  { %p1633_p1 = pnand %p1632_p0, %p1626_p11 }
  0x20   :  { %1636 = shalt.err (!%p1633_p1)
}
  0x21   :  { %48 = dma.hbm_to_vmem [thread:$0]  %s1865_s6, 1024, %s43_s20, [#allocation5], %s1642_s15, %s1642_s15, %s1643_s16  }
  0x22   :  { %1637 = dma.done.wait [#allocation3], 1024  }
  0x23   :  { %1638 = vsyncadd [#allocation3], 4294966272 }
  0x24   :  { %1639 = dma.done.wait [#allocation5], 1024  }
  0x25   :  { %1640 = vsyncadd [#allocation5], 4294966272  ;;  %v1553_v0 = vld [vmem:[%s1860_s1] sm:$0xff]   ;;  %v1554_v1 = vld [vmem:[%s1860_s1 + $0x8] sm:$0xff]  }
  0x26   :  { %1357 = vmatprep.subr.bf16.mxu0 %v1553_v0  ;;  %v1555_v2 = vld [vmem:[%s1860_s1 + $0x10] sm:$0xff]   ;;  %v1556_v3 = vld [vmem:[%s1860_s1 + $0x18] sm:$0xff]   ;;  %v1729_v4 = vld [vmem:[%s1859_s0] sm:$0xff]  }
  0x27   :  { %1358 = vmatpush3.bf16.msra.mxu0 %v1553_v0  ;;  %1373 = vmatprep.mubr.bf16.mxu0 %v1729_v4  ;;  %v1557_v5 = vld [vmem:[%s1860_s1 + $0x20] sm:$0xff]   ;;  %v1558_v6 = vld [vmem:[%s1860_s1 + $0x28] sm:$0xff]   ;;  %v1559_v9 = vld [vmem:[%s1860_s1 + $0x30] sm:$0xff]  }
  0x28   :  { %1359 = vmatprep.subr.bf16.mxu0 %v1554_v1  ;;  %v1569_v7 = vld [vmem:[%s1861_s2] sm:$0xff]   ;;  %v1570_v8 = vld [vmem:[%s1861_s2 + $0x8] sm:$0xff]   ;;  %v1571_v10 = vld [vmem:[%s1861_s2 + $0x10] sm:$0xff]  }
  0x29   :  { %1389 = vmatprep.subr.bf16.mxu1 %v1569_v7  ;;  %v1560_v11 = vld [vmem:[%s1860_s1 + $0x38] sm:$0xff]   ;;  %v1573_v13 = vld [vmem:[%s1861_s2 + $0x20] sm:$0xff]   ;;  %v1762_v14 = vld [vmem:[%s1859_s0 + $0x8] sm:$0xff]  }
  0x2a   :  { %1390 = vmatpush3.bf16.msra.mxu1 %v1569_v7  ;;  %v1572_v12 = vld [vmem:[%s1861_s2 + $0x18] sm:$0xff]   ;;  %v1767_v15 = vld [vmem:[%s1859_s0 + $0x10] sm:$0xff]   ;;  %v1574_v16 = vld [vmem:[%s1861_s2 + $0x28] sm:$0xff]  }
  0x2b   :  { %1360 = vmatpush3.bf16.msra.mxu0 %v1554_v1  ;;  %1391 = vmatprep.subr.bf16.mxu1 %v1570_v8  ;;  %v1575_v17 = vld [vmem:[%s1861_s2 + $0x30] sm:$0xff]   ;;  %v1780_v18 = vld [vmem:[%s1859_s0 + $0x18] sm:$0xff]   ;;  %v1785_v19 = vld [vmem:[%s1859_s0 + $0x20] sm:$0xff]  }
  0x2c   :  { %1361 = vmatprep.subr.bf16.mxu0 %v1555_v2  ;;  %v1792_v20 = vld [vmem:[%s1859_s0 + $0x28] sm:$0xff]   ;;  %v1797_v21 = vld [vmem:[%s1859_s0 + $0x30] sm:$0xff]   ;;  %v1804_v22 = vld [vmem:[%s1859_s0 + $0x38] sm:$0xff]  }
  0x2d   :  { %v1576_v23 = vld [vmem:[%s1861_s2 + $0x38] sm:$0xff]   ;;  %v1577_v24 = vld [vmem:[#allocation2] sm:$0xff]   ;;  %v1578_v25 = vld [vmem:[#allocation2 + $0x8] sm:$0xff]  }
  0x2e   :  { %1392 = vmatpush3.bf16.msra.mxu1 %v1570_v8  ;;  %v1579_v26 = vld [vmem:[#allocation2 + $0x10] sm:$0xff]   ;;  %v1580_v27 = vld [vmem:[#allocation2 + $0x18] sm:$0xff]   ;;  %v1581_v28 = vld [vmem:[#allocation2 + $0x20] sm:$0xff]  }
  0x2f   :  { %1362 = vmatpush3.bf16.msra.mxu0 %v1555_v2  ;;  %1393 = vmatprep.subr.bf16.mxu1 %v1571_v10  ;;  %v1582_v29 = vld [vmem:[#allocation2 + $0x28] sm:$0xff]   ;;  %v1583_v54 = vld [vmem:[#allocation2 + $0x30] sm:$0xff]   ;;  %v1584_v55 = vld [vmem:[#allocation2 + $0x38] sm:$0xff]  }
  0x30   :  { %1363 = vmatprep.subr.bf16.mxu0 %v1556_v3  ;;  %v1155_v56 = vld [vmem:[%s1862_s3] ss:$0 sm:$0xff] }
  0x32   :  { %1394 = vmatpush3.bf16.msra.mxu1 %v1571_v10 }
  0x33   :  { %1364 = vmatpush3.bf16.msra.mxu0 %v1556_v3  ;;  %1395 = vmatprep.subr.bf16.mxu1 %v1572_v12 }
  0x34   :  { %1365 = vmatprep.subr.bf16.mxu0 %v1557_v5 }
  0x36   :  { %1396 = vmatpush3.bf16.msra.mxu1 %v1572_v12 }
  0x37   :  { %1366 = vmatpush3.bf16.msra.mxu0 %v1557_v5  ;;  %1397 = vmatprep.subr.bf16.mxu1 %v1573_v13 }
  0x38   :  { %1367 = vmatprep.subr.bf16.mxu0 %v1558_v6 }
  0x3a   :  { %1398 = vmatpush3.bf16.msra.mxu1 %v1573_v13 }
  0x3b   :  { %1368 = vmatpush3.bf16.msra.mxu0 %v1558_v6  ;;  %1399 = vmatprep.subr.bf16.mxu1 %v1574_v16 }
  0x3c   :  { %1369 = vmatprep.subr.bf16.mxu0 %v1559_v9 }
  0x3e   :  { %1400 = vmatpush3.bf16.msra.mxu1 %v1574_v16 }
  0x3f   :  { %1370 = vmatpush3.bf16.msra.mxu0 %v1559_v9  ;;  %1401 = vmatprep.subr.bf16.mxu1 %v1575_v17 }
  0x40   :  { %1371 = vmatprep.subr.bf16.mxu0 %v1560_v11 }
  0x42   :  { %1402 = vmatpush3.bf16.msra.mxu1 %v1575_v17 }
  0x43   :  { %1372 = vmatpush3.bf16.msra.mxu0 %v1560_v11  ;;  %1403 = vmatprep.subr.bf16.mxu1 %v1576_v23 }
  0x44   :  { %1421 = vmatprep.subr.bf16.mxu0 %v1577_v24 }
  0x46   :  { %1374 = vmatmul.mubr.bf16.vlgmr.msra.gmra.mrb[0].mxu0 %v1762_v14  ;;  %1404 = vmatpush3.bf16.msra.mxu1 %v1576_v23 }
  0x47   :  { %1377 = vmatprep.mubr.bf16.mxu0 %v1767_v15  ;;  %1422 = vmatpush3.bf16.msra.mxu0 %v1577_v24 }
  0x48   :  { %1423 = vmatprep.subr.bf16.mxu0 %v1578_v25 }
  0x4b   :  { %1424 = vmatpush3.bf16.msra.mxu0 %v1578_v25 }
  0x4c   :  { %1425 = vmatprep.subr.bf16.mxu0 %v1579_v26 }
  0x4e   :  { %1378 = vmatmul.mubr.bf16.gmra.mrb[4].mxu0 %v1780_v18 }
  0x4f   :  { %1381 = vmatprep.mubr.bf16.mxu0 %v1785_v19  ;;  %1426 = vmatpush3.bf16.msra.mxu0 %v1579_v26 }
  0x50   :  { %1427 = vmatprep.subr.bf16.mxu0 %v1580_v27 }
  0x53   :  { %1428 = vmatpush3.bf16.msra.mxu0 %v1580_v27 }
  0x54   :  { %1429 = vmatprep.subr.bf16.mxu0 %v1581_v28 }
  0x56   :  { %1382 = vmatmul.mubr.bf16.gmra.mrb[8].mxu0 %v1792_v20 }
  0x57   :  { %1385 = vmatprep.mubr.bf16.mxu0 %v1797_v21  ;;  %1430 = vmatpush3.bf16.msra.mxu0 %v1581_v28 }
  0x58   :  { %1431 = vmatprep.subr.bf16.mxu0 %v1582_v29 }
  0x5b   :  { %1432 = vmatpush3.bf16.msra.mxu0 %v1582_v29 }
  0x5c   :  { %1433 = vmatprep.subr.bf16.mxu0 %v1583_v54 }
  0x5e   :  { %1386 = vmatmul.mubr.bf16.gmra.mrb[12].mxu0 %v1804_v22 }
  0x5f   :  { %1434 = vmatpush3.bf16.msra.mxu0 %v1583_v54 }
  0x60   :  { %1435 = vmatprep.subr.bf16.mxu0 %v1584_v55 }
  0x63   :  { %1436 = vmatpush3.bf16.msra.mxu0 %v1584_v55 }
 0x119   :  { %v1375_v30 = vpop.f32.mrb[0].mxu0 }
 0x11a   :  { %v237_v31 = vpop.f32.mrb[1].mxu0 }
 0x11b   :  { %v1376_v32 = vpop.f32.mrb[2].mxu0 }
 0x11c   :  { %v301_v33 = vpack.c.bf16 %v1376_v32, %v1375_v30  ;;  %v240_v34 = vpop.f32.mrb[3].mxu0 }
 0x11d   :  { %v300_v35 = vpack.c.bf16 %v240_v34, %v237_v31 }
 0x11f   :  { %1405 = vmatprep.mubr.bf16.mxu1 %v300_v35 }
 0x120   :  { %1406 = vmatmul.mubr.bf16.vlgmr.msra.gmra.mrb[0].mxu1 %v301_v33 }
 0x121   :  { %v1379_v36 = vpop.f32.mrb[4].mxu0 }
 0x122   :  { %v253_v37 = vpop.f32.mrb[5].mxu0 }
 0x123   :  { %v1380_v38 = vpop.f32.mrb[6].mxu0 }
 0x124   :  { %v303_v39 = vpack.c.bf16 %v1380_v38, %v1379_v36  ;;  %v256_v40 = vpop.f32.mrb[7].mxu0 }
 0x125   :  { %v302_v41 = vpack.c.bf16 %v256_v40, %v253_v37 }
 0x127   :  { %1409 = vmatprep.mubr.bf16.mxu1 %v302_v41 }
 0x128   :  { %1410 = vmatmul.mubr.bf16.gmra.mrb[4].mxu1 %v303_v39 }
 0x129   :  { %v1383_v42 = vpop.f32.mrb[8].mxu0 }
 0x12a   :  { %v269_v43 = vpop.f32.mrb[9].mxu0 }
 0x12b   :  { %v1384_v44 = vpop.f32.mrb[10].mxu0 }
 0x12c   :  { %v305_v45 = vpack.c.bf16 %v1384_v44, %v1383_v42  ;;  %v272_v46 = vpop.f32.mrb[11].mxu0 }
 0x12d   :  { %v304_v47 = vpack.c.bf16 %v272_v46, %v269_v43 }
 0x12f   :  { %1413 = vmatprep.mubr.bf16.mxu1 %v304_v47 }
 0x130   :  { %1414 = vmatmul.mubr.bf16.gmra.mrb[8].mxu1 %v305_v45 }
 0x131   :  { %v1387_v48 = vpop.f32.mrb[12].mxu0 }
 0x132   :  { %v285_v49 = vpop.f32.mrb[13].mxu0 }
 0x133   :  { %v1388_v50 = vpop.f32.mrb[14].mxu0 }
 0x134   :  { %v307_v51 = vpack.c.bf16 %v1388_v50, %v1387_v48  ;;  %v288_v52 = vpop.f32.mrb[15].mxu0 }
 0x135   :  { %v306_v53 = vpack.c.bf16 %v288_v52, %v285_v49 }
 0x137   :  { %1417 = vmatprep.mubr.bf16.mxu1 %v306_v53 }
 0x138   :  { %1418 = vmatmul.mubr.bf16.gmra.mrb[12].mxu1 %v307_v51 }
 0x139   :  { %1469 = vmatprep.mubr.bf16.mxu1 %v1729_v4 }
 0x1f3   :  { %v1407_v57 = vpop.f32.mrb[0].mxu1 }
 0x1f4   :  { %v405_v58 = vadd.f32 %v1407_v57, %v1155_v56  ;;  %v396_v59 = vpop.f32.mrb[1].mxu1 }
 0x1f5   :  { %v397_v60 = vadd.f32 %v1155_v56, %v396_v59  ;;  %v1408_v61 = vpop.f32.mrb[2].mxu1  ;;  %v1586_v59 = vld [vmem:[#allocation4 + $0x8] sm:$0xff]  }
 0x1f6   :  { %v408_v62 = vadd.f32 %v1408_v61, %v1155_v56  ;;  %v399_v63 = vpop.f32.mrb[3].mxu1  ;;  %v461_v1 = vmax.f32 %v405_v58, 0.0  ;;  %v1585_v58 = vld [vmem:[#allocation4] sm:$0xff]   ;;  %v1588_v61 = vld [vmem:[#allocation4 + $0x18] sm:$0xff]  }
 0x1f7   :  { %v400_v0 = vadd.f32 %v1155_v56, %v399_v63  ;;  %v459_v3 = vmax.f32 %v397_v60, 0.0  ;;  %1485 = vmatprep.subr.bf16.mxu0 %v1585_v58  ;;  %v1587_v60 = vld [vmem:[#allocation4 + $0x10] sm:$0xff]  }
 0x1f8   :  { %v462_v2 = vmax.f32 %v408_v62, 0.0  ;;  %v1590_v62 = vld [vmem:[#allocation4 + $0x28] sm:$0xff]  }
 0x1f9   :  { %v460_v5 = vmax.f32 %v400_v0, 0.0 }
 0x1fa   :  { %v476_v6 = vpack.c.bf16 %v462_v2, %v461_v1 }
 0x1fb   :  { %v475_v7 = vpack.c.bf16 %v460_v5, %v459_v3  ;;  %v1411_v8 = vpop.f32.mrb[4].mxu1 }
 0x1fc   :  { %v421_v9 = vadd.f32 %v1411_v8, %v1155_v56  ;;  %v412_v10 = vpop.f32.mrb[5].mxu1 }
 0x1fd   :  { %v413_v11 = vadd.f32 %v1155_v56, %v412_v10  ;;  %v1412_v12 = vpop.f32.mrb[6].mxu1  ;;  %1437 = vmatprep.mubr.bf16.mxu0 %v475_v7 }
 0x1fe   :  { %v424_v13 = vadd.f32 %v1412_v12, %v1155_v56  ;;  %v415_v16 = vpop.f32.mrb[7].mxu1  ;;  %1438 = vmatmul.mubr.bf16.vlgmr.msra.gmra.mrb[16].mxu0 %v476_v6  ;;  %v465_v23 = vmax.f32 %v421_v9, 0.0 }
 0x1ff   :  { %v416_v17 = vadd.f32 %v1155_v56, %v415_v16  ;;  %v463_v25 = vmax.f32 %v413_v11, 0.0  ;;  %1486 = vmatpush3.bf16.msra.mxu0 %v1585_v58 }
 0x200   :  { %v466_v24 = vmax.f32 %v424_v13, 0.0  ;;  %1487 = vmatprep.subr.bf16.mxu0 %v1586_v59 }
 0x201   :  { %v464_v26 = vmax.f32 %v416_v17, 0.0 }
 0x202   :  { %v478_v27 = vpack.c.bf16 %v466_v24, %v465_v23 }
 0x203   :  { %v477_v28 = vpack.c.bf16 %v464_v26, %v463_v25  ;;  %v1415_v29 = vpop.f32.mrb[8].mxu1  ;;  %1488 = vmatpush3.bf16.msra.mxu0 %v1586_v59 }
 0x204   :  { %v437_v30 = vadd.f32 %v1415_v29, %v1155_v56  ;;  %v428_v31 = vpop.f32.mrb[9].mxu1  ;;  %1489 = vmatprep.subr.bf16.mxu0 %v1587_v60 }
 0x205   :  { %v429_v32 = vadd.f32 %v1155_v56, %v428_v31  ;;  %v1416_v33 = vpop.f32.mrb[10].mxu1  ;;  %1441 = vmatprep.mubr.bf16.mxu0 %v477_v28  ;;  %v1591_v31 = vld [vmem:[#allocation4 + $0x30] sm:$0xff]  }
 0x206   :  { %v440_v34 = vadd.f32 %v1416_v33, %v1155_v56  ;;  %v431_v35 = vpop.f32.mrb[11].mxu1  ;;  %1442 = vmatmul.mubr.bf16.gmra.mrb[20].mxu0 %v478_v27  ;;  %v469_v37 = vmax.f32 %v437_v30, 0.0  ;;  %v1172_v33 = vld [vmem:[%s1864_s5] ss:$0 sm:$0xff] }
 0x207   :  { %v432_v36 = vadd.f32 %v1155_v56, %v431_v35  ;;  %v467_v39 = vmax.f32 %v429_v32, 0.0  ;;  %1490 = vmatpush3.bf16.msra.mxu0 %v1587_v60  ;;  %v1592_v32 = vld [vmem:[#allocation4 + $0x38] sm:$0xff]  }
 0x208   :  { %v470_v38 = vmax.f32 %v440_v34, 0.0  ;;  %1491 = vmatprep.subr.bf16.mxu0 %v1588_v61 }
 0x209   :  { %v468_v40 = vmax.f32 %v432_v36, 0.0 }
 0x20a   :  { %v480_v41 = vpack.c.bf16 %v470_v38, %v469_v37 }
 0x20b   :  { %v479_v42 = vpack.c.bf16 %v468_v40, %v467_v39  ;;  %v1419_v43 = vpop.f32.mrb[12].mxu1  ;;  %1492 = vmatpush3.bf16.msra.mxu0 %v1588_v61 }
 0x20c   :  { %v453_v44 = vadd.f32 %v1419_v43, %v1155_v56  ;;  %v444_v45 = vpop.f32.mrb[13].mxu1 }
 0x20d   :  { %v445_v46 = vadd.f32 %v1155_v56, %v444_v45  ;;  %v1420_v47 = vpop.f32.mrb[14].mxu1  ;;  %1445 = vmatprep.mubr.bf16.mxu0 %v479_v42 }
 0x20e   :  { %v456_v48 = vadd.f32 %v1420_v47, %v1155_v56  ;;  %v447_v49 = vpop.f32.mrb[15].mxu1  ;;  %1446 = vmatmul.mubr.bf16.gmra.mrb[24].mxu0 %v480_v41  ;;  %v473_v51 = vmax.f32 %v453_v44, 0.0 }
 0x20f   :  { %v448_v50 = vadd.f32 %v1155_v56, %v447_v49  ;;  %v471_v53 = vmax.f32 %v445_v46, 0.0  ;;  %v1589_v56 = vld [vmem:[#allocation4 + $0x20] sm:$0xff]  }
 0x210   :  { %v474_v52 = vmax.f32 %v456_v48, 0.0  ;;  %1493 = vmatprep.subr.bf16.mxu0 %v1589_v56 }
 0x211   :  { %v472_v54 = vmax.f32 %v448_v50, 0.0  ;;  %1494 = vmatpush3.bf16.msra.mxu0 %v1589_v56 }
 0x212   :  { %v482_v55 = vpack.c.bf16 %v474_v52, %v473_v51  ;;  %1495 = vmatprep.subr.bf16.mxu0 %v1590_v62 }
 0x213   :  { %v481_v57 = vpack.c.bf16 %v472_v54, %v471_v53 }
 0x215   :  { %1449 = vmatprep.mubr.bf16.mxu0 %v481_v57  ;;  %1496 = vmatpush3.bf16.msra.mxu0 %v1590_v62 }
 0x216   :  { %1450 = vmatmul.mubr.bf16.gmra.mrb[28].mxu0 %v482_v55  ;;  %1497 = vmatprep.subr.bf16.mxu0 %v1591_v31 }
 0x219   :  { %1498 = vmatpush3.bf16.msra.mxu0 %v1591_v31 }
 0x21a   :  { %1499 = vmatprep.subr.bf16.mxu0 %v1592_v32 }
 0x21d   :  { %1500 = vmatpush3.bf16.msra.mxu0 %v1592_v32 }
 0x2d1   :  { %v1439_v63 = vpop.f32.mrb[16].mxu0 }
 0x2d2   :  { %v582_v0 = vpop.f32.mrb[17].mxu0 }
 0x2d3   :  { %v1440_v1 = vpop.f32.mrb[18].mxu0 }
 0x2d4   :  { %v646_v2 = vpack.c.bf16 %v1440_v1, %v1439_v63  ;;  %v585_v3 = vpop.f32.mrb[19].mxu0 }
 0x2d5   :  { %v645_v5 = vpack.c.bf16 %v585_v3, %v582_v0 }
 0x2d7   :  { %1453 = vmatprep.subr.bf16.mxu1 %v645_v5 }
 0x2d8   :  { %1454 = vmatpush3.bf16.msra.mxu1 %v645_v5 }
 0x2d9   :  { %v1443_v6 = vpop.f32.mrb[20].mxu0  ;;  %1455 = vmatprep.subr.bf16.mxu1 %v646_v2 }
 0x2da   :  { %v598_v7 = vpop.f32.mrb[21].mxu0 }
 0x2db   :  { %v1444_v8 = vpop.f32.mrb[22].mxu0 }
 0x2dc   :  { %v648_v9 = vpack.c.bf16 %v1444_v8, %v1443_v6  ;;  %v601_v10 = vpop.f32.mrb[23].mxu0  ;;  %1456 = vmatpush3.bf16.msra.mxu1 %v646_v2 }
 0x2dd   :  { %v647_v11 = vpack.c.bf16 %v601_v10, %v598_v7 }
 0x2df   :  { %1457 = vmatprep.subr.bf16.mxu1 %v647_v11 }
 0x2e0   :  { %1458 = vmatpush3.bf16.msra.mxu1 %v647_v11 }
 0x2e1   :  { %v1447_v12 = vpop.f32.mrb[24].mxu0  ;;  %1459 = vmatprep.subr.bf16.mxu1 %v648_v9 }
 0x2e2   :  { %v614_v13 = vpop.f32.mrb[25].mxu0 }
 0x2e3   :  { %v1448_v16 = vpop.f32.mrb[26].mxu0 }
 0x2e4   :  { %v650_v17 = vpack.c.bf16 %v1448_v16, %v1447_v12  ;;  %v617_v23 = vpop.f32.mrb[27].mxu0  ;;  %1460 = vmatpush3.bf16.msra.mxu1 %v648_v9 }
 0x2e5   :  { %v649_v24 = vpack.c.bf16 %v617_v23, %v614_v13 }
 0x2e7   :  { %1461 = vmatprep.subr.bf16.mxu1 %v649_v24 }
 0x2e8   :  { %1462 = vmatpush3.bf16.msra.mxu1 %v649_v24 }
 0x2e9   :  { %v1451_v25 = vpop.f32.mrb[28].mxu0  ;;  %1463 = vmatprep.subr.bf16.mxu1 %v650_v17 }
 0x2ea   :  { %v630_v26 = vpop.f32.mrb[29].mxu0 }
 0x2eb   :  { %v1452_v27 = vpop.f32.mrb[30].mxu0 }
 0x2ec   :  { %v652_v28 = vpack.c.bf16 %v1452_v27, %v1451_v25  ;;  %v633_v29 = vpop.f32.mrb[31].mxu0  ;;  %1464 = vmatpush3.bf16.msra.mxu1 %v650_v17 }
 0x2ed   :  { %v651_v30 = vpack.c.bf16 %v633_v29, %v630_v26 }
 0x2ef   :  { %1465 = vmatprep.subr.bf16.mxu1 %v651_v30 }
 0x2f0   :  { %1466 = vmatpush3.bf16.msra.mxu1 %v651_v30 }
 0x2f1   :  { %1467 = vmatprep.subr.bf16.mxu1 %v652_v28 }
 0x2f4   :  { %1468 = vmatpush3.bf16.msra.mxu1 %v652_v28 }
 0x2f7   :  { %1470 = vmatmul.mubr.bf16.vlgmr.msra.gmra.mrb[16].mxu1 %v1762_v14 }
 0x2f8   :  { %1473 = vmatprep.mubr.bf16.mxu1 %v1767_v15 }
 0x2ff   :  { %1474 = vmatmul.mubr.bf16.gmra.mrb[20].mxu1 %v1780_v18 }
 0x300   :  { %1477 = vmatprep.mubr.bf16.mxu1 %v1785_v19 }
 0x307   :  { %1478 = vmatmul.mubr.bf16.gmra.mrb[24].mxu1 %v1792_v20 }
 0x308   :  { %1481 = vmatprep.mubr.bf16.mxu1 %v1797_v21 }
 0x30f   :  { %1482 = vmatmul.mubr.bf16.gmra.mrb[28].mxu1 %v1804_v22 }
 0x310   :  { %1533 = vmatprep.mubr.bf16.mxu1 %v1729_v4 }
 0x3ca   :  { %v1471_v34 = vpop.f32.mrb[16].mxu1 }
 0x3cb   :  { %v702_v35 = vadd.f32 %v1471_v34, %v1172_v33  ;;  %v693_v36 = vpop.f32.mrb[17].mxu1 }
 0x3cc   :  { %v694_v37 = vadd.f32 %v1172_v33, %v693_v36  ;;  %v1472_v38 = vpop.f32.mrb[18].mxu1 }
 0x3cd   :  { %v705_v39 = vadd.f32 %v1472_v38, %v1172_v33  ;;  %v696_v40 = vpop.f32.mrb[19].mxu1  ;;  %v758_v42 = vmax.f32 %v702_v35, 0.0 }
 0x3ce   :  { %v697_v41 = vadd.f32 %v1172_v33, %v696_v40  ;;  %v756_v43 = vmax.f32 %v694_v37, 0.0 }
 0x3cf   :  { %v759_v4 = vmax.f32 %v705_v39, 0.0 }
 0x3d0   :  { %v757_v44 = vmax.f32 %v697_v41, 0.0 }
 0x3d1   :  { %v773_v45 = vpack.c.bf16 %v759_v4, %v758_v42 }
 0x3d2   :  { %v772_v46 = vpack.c.bf16 %v757_v44, %v756_v43  ;;  %v1475_v47 = vpop.f32.mrb[20].mxu1 }
 0x3d3   :  { %v718_v48 = vadd.f32 %v1475_v47, %v1172_v33  ;;  %v709_v49 = vpop.f32.mrb[21].mxu1 }
 0x3d4   :  { %v710_v50 = vadd.f32 %v1172_v33, %v709_v49  ;;  %v1476_v51 = vpop.f32.mrb[22].mxu1  ;;  %1501 = vmatprep.mubr.bf16.mxu0 %v772_v46 }
 0x3d5   :  { %v721_v52 = vadd.f32 %v1476_v51, %v1172_v33  ;;  %v712_v53 = vpop.f32.mrb[23].mxu1  ;;  %1502 = vmatmul.mubr.bf16.vlgmr.msra.gmra.mrb[32].mxu0 %v773_v45  ;;  %v762_v55 = vmax.f32 %v718_v48, 0.0 }
 0x3d6   :  { %v713_v54 = vadd.f32 %v1172_v33, %v712_v53  ;;  %v760_v58 = vmax.f32 %v710_v50, 0.0 }
 0x3d7   :  { %v763_v57 = vmax.f32 %v721_v52, 0.0 }
 0x3d8   :  { %v761_v59 = vmax.f32 %v713_v54, 0.0 }
 0x3d9   :  { %v775_v60 = vpack.c.bf16 %v763_v57, %v762_v55 }
 0x3da   :  { %v774_v61 = vpack.c.bf16 %v761_v59, %v760_v58  ;;  %v1479_v56 = vpop.f32.mrb[24].mxu1  ;;  %v1181_v58 = vld [vmem:[%s1866_s7] ss:$0 sm:$0xff] }
 0x3db   :  { %v734_v62 = vadd.f32 %v1479_v56, %v1172_v33  ;;  %v725_v63 = vpop.f32.mrb[25].mxu1 }
 0x3dc   :  { %v726_v0 = vadd.f32 %v1172_v33, %v725_v63  ;;  %v1480_v1 = vpop.f32.mrb[26].mxu1  ;;  %1505 = vmatprep.mubr.bf16.mxu0 %v774_v61 }
 0x3dd   :  { %v737_v2 = vadd.f32 %v1480_v1, %v1172_v33  ;;  %v728_v3 = vpop.f32.mrb[27].mxu1  ;;  %1506 = vmatmul.mubr.bf16.gmra.mrb[36].mxu0 %v775_v60  ;;  %v766_v6 = vmax.f32 %v734_v62, 0.0 }
 0x3de   :  { %v729_v5 = vadd.f32 %v1172_v33, %v728_v3  ;;  %v764_v8 = vmax.f32 %v726_v0, 0.0 }
 0x3df   :  { %v767_v7 = vmax.f32 %v737_v2, 0.0 }
 0x3e0   :  { %v765_v9 = vmax.f32 %v729_v5, 0.0 }
 0x3e1   :  { %v777_v10 = vpack.c.bf16 %v767_v7, %v766_v6 }
 0x3e2   :  { %v776_v11 = vpack.c.bf16 %v765_v9, %v764_v8  ;;  %v1483_v12 = vpop.f32.mrb[28].mxu1 }
 0x3e3   :  { %v750_v13 = vadd.f32 %v1483_v12, %v1172_v33  ;;  %v741_v16 = vpop.f32.mrb[29].mxu1 }
 0x3e4   :  { %v742_v17 = vadd.f32 %v1172_v33, %v741_v16  ;;  %v1484_v23 = vpop.f32.mrb[30].mxu1  ;;  %1509 = vmatprep.mubr.bf16.mxu0 %v776_v11 }
 0x3e5   :  { %v753_v24 = vadd.f32 %v1484_v23, %v1172_v33  ;;  %v744_v25 = vpop.f32.mrb[31].mxu1  ;;  %1510 = vmatmul.mubr.bf16.gmra.mrb[40].mxu0 %v777_v10  ;;  %v770_v27 = vmax.f32 %v750_v13, 0.0 }
 0x3e6   :  { %v745_v26 = vadd.f32 %v1172_v33, %v744_v25  ;;  %v768_v29 = vmax.f32 %v742_v17, 0.0 }
 0x3e7   :  { %v771_v28 = vmax.f32 %v753_v24, 0.0 }
 0x3e8   :  { %v769_v30 = vmax.f32 %v745_v26, 0.0 }
 0x3e9   :  { %v779_v31 = vpack.c.bf16 %v771_v28, %v770_v27 }
 0x3ea   :  { %v778_v32 = vpack.c.bf16 %v769_v30, %v768_v29 }
 0x3ec   :  { %1513 = vmatprep.mubr.bf16.mxu0 %v778_v32 }
 0x3ed   :  { %1514 = vmatmul.mubr.bf16.gmra.mrb[44].mxu0 %v779_v31 }
 0x4a8   :  { %v1503_v34 = vpop.f32.mrb[32].mxu0 }
 0x4a9   :  { %v879_v35 = vpop.f32.mrb[33].mxu0 }
 0x4aa   :  { %v1504_v36 = vpop.f32.mrb[34].mxu0 }
 0x4ab   :  { %v943_v37 = vpack.c.bf16 %v1504_v36, %v1503_v34  ;;  %v882_v38 = vpop.f32.mrb[35].mxu0 }
 0x4ac   :  { %v942_v39 = vpack.c.bf16 %v882_v38, %v879_v35 }
 0x4ae   :  { %1517 = vmatprep.subr.bf16.mxu1 %v942_v39 }
 0x4af   :  { %1518 = vmatpush3.bf16.msra.mxu1 %v942_v39 }
 0x4b0   :  { %v1507_v40 = vpop.f32.mrb[36].mxu0  ;;  %1519 = vmatprep.subr.bf16.mxu1 %v943_v37 }
 0x4b1   :  { %v895_v41 = vpop.f32.mrb[37].mxu0 }
 0x4b2   :  { %v1508_v33 = vpop.f32.mrb[38].mxu0 }
 0x4b3   :  { %v945_v42 = vpack.c.bf16 %v1508_v33, %v1507_v40  ;;  %v898_v4 = vpop.f32.mrb[39].mxu0  ;;  %1520 = vmatpush3.bf16.msra.mxu1 %v943_v37 }
 0x4b4   :  { %v944_v43 = vpack.c.bf16 %v898_v4, %v895_v41 }
 0x4b6   :  { %1521 = vmatprep.subr.bf16.mxu1 %v944_v43 }
 0x4b7   :  { %1522 = vmatpush3.bf16.msra.mxu1 %v944_v43 }
 0x4b8   :  { %v1511_v44 = vpop.f32.mrb[40].mxu0  ;;  %1523 = vmatprep.subr.bf16.mxu1 %v945_v42 }
 0x4b9   :  { %v911_v45 = vpop.f32.mrb[41].mxu0 }
 0x4ba   :  { %v1512_v46 = vpop.f32.mrb[42].mxu0 }
 0x4bb   :  { %v947_v47 = vpack.c.bf16 %v1512_v46, %v1511_v44  ;;  %v914_v48 = vpop.f32.mrb[43].mxu0  ;;  %1524 = vmatpush3.bf16.msra.mxu1 %v945_v42 }
 0x4bc   :  { %v946_v49 = vpack.c.bf16 %v914_v48, %v911_v45 }
 0x4be   :  { %1525 = vmatprep.subr.bf16.mxu1 %v946_v49 }
 0x4bf   :  { %1526 = vmatpush3.bf16.msra.mxu1 %v946_v49 }
 0x4c0   :  { %v1515_v50 = vpop.f32.mrb[44].mxu0  ;;  %1527 = vmatprep.subr.bf16.mxu1 %v947_v47 }
 0x4c1   :  { %v927_v51 = vpop.f32.mrb[45].mxu0 }
 0x4c2   :  { %v1516_v52 = vpop.f32.mrb[46].mxu0 }
 0x4c3   :  { %v949_v53 = vpack.c.bf16 %v1516_v52, %v1515_v50  ;;  %v930_v54 = vpop.f32.mrb[47].mxu0  ;;  %1528 = vmatpush3.bf16.msra.mxu1 %v947_v47 }
 0x4c4   :  { %v948_v55 = vpack.c.bf16 %v930_v54, %v927_v51 }
 0x4c6   :  { %1529 = vmatprep.subr.bf16.mxu1 %v948_v55 }
 0x4c7   :  { %1530 = vmatpush3.bf16.msra.mxu1 %v948_v55 }
 0x4c8   :  { %1531 = vmatprep.subr.bf16.mxu1 %v949_v53 }
 0x4cb   :  { %1532 = vmatpush3.bf16.msra.mxu1 %v949_v53 }
 0x4ce   :  { %1534 = vmatmul.mubr.bf16.vlgmr.msra.gmra.mrb[32].mxu1 %v1762_v14 }
 0x4cf   :  { %1537 = vmatprep.mubr.bf16.mxu1 %v1767_v15 }
 0x4d6   :  { %1538 = vmatmul.mubr.bf16.gmra.mrb[36].mxu1 %v1780_v18 }
 0x4d7   :  { %1541 = vmatprep.mubr.bf16.mxu1 %v1785_v19 }
 0x4de   :  { %1542 = vmatmul.mubr.bf16.gmra.mrb[40].mxu1 %v1792_v20 }
 0x4df   :  { %1545 = vmatprep.mubr.bf16.mxu1 %v1797_v21 }
 0x4e6   :  { %1546 = vmatmul.mubr.bf16.gmra.mrb[44].mxu1 %v1804_v22 }
 0x5a1   :  { %v1535_v57 = vpop.f32.mrb[32].mxu1 }
 0x5a2   :  { %v990_v59 = vpop.f32.mrb[33].mxu1  ;;  %v999_v14 = vadd.f32 %v1535_v57, %v1181_v58 }
 0x5a3   :  { %v1536_v60 = vpop.f32.mrb[34].mxu1  ;;  %v991_v56 = vadd.f32 %v1181_v58, %v990_v59 }
 0x5a4   :  { %v1002_v61 = vadd.f32 %v1536_v60, %v1181_v58  ;;  %v993_v15 = vpop.f32.mrb[35].mxu1 }
 0x5a5   :  { %v994_v18 = vadd.f32 %v1181_v58, %v993_v15 }
 0x5a6   :  { %v1222_v62 = vpack.c.bf16 %v1002_v61, %v999_v14 }
 0x5a7   :  { %v1217_v19 = vpack.c.bf16 %v994_v18, %v991_v56 }
 0x5a8   :  { %1254 = vst [vmem:[%s1867_s8 + $0x8] sm:$0xff] %v1222_v62  }
 0x5a9   :  { %1218 = vst [vmem:[%s1867_s8] sm:$0xff] %v1217_v19   ;;  %v1539_v20 = vpop.f32.mrb[36].mxu1 }
 0x5aa   :  { %v1006_v21 = vpop.f32.mrb[37].mxu1  ;;  %v1015_v63 = vadd.f32 %v1539_v20, %v1181_v58 }
 0x5ab   :  { %v1540_v22 = vpop.f32.mrb[38].mxu1  ;;  %v1007_v2 = vadd.f32 %v1181_v58, %v1006_v21 }
 0x5ac   :  { %v1018_v0 = vadd.f32 %v1540_v22, %v1181_v58  ;;  %v1009_v1 = vpop.f32.mrb[39].mxu1 }
 0x5ad   :  { %v1010_v3 = vadd.f32 %v1181_v58, %v1009_v1 }
 0x5ae   :  { %v1232_v5 = vpack.c.bf16 %v1018_v0, %v1015_v63 }
 0x5af   :  { %v1227_v6 = vpack.c.bf16 %v1010_v3, %v1007_v2 }
 0x5b0   :  { %1256 = vst [vmem:[%s1867_s8 + $0x18] sm:$0xff] %v1232_v5  }
 0x5b1   :  { %1255 = vst [vmem:[%s1867_s8 + $0x10] sm:$0xff] %v1227_v6   ;;  %v1543_v7 = vpop.f32.mrb[40].mxu1 }
 0x5b2   :  { %v1022_v8 = vpop.f32.mrb[41].mxu1  ;;  %v1031_v10 = vadd.f32 %v1543_v7, %v1181_v58 }
 0x5b3   :  { %v1544_v9 = vpop.f32.mrb[42].mxu1  ;;  %v1023_v13 = vadd.f32 %v1181_v58, %v1022_v8 }
 0x5b4   :  { %v1034_v11 = vadd.f32 %v1544_v9, %v1181_v58  ;;  %v1025_v12 = vpop.f32.mrb[43].mxu1 }
 0x5b5   :  { %v1026_v16 = vadd.f32 %v1181_v58, %v1025_v12 }
 0x5b6   :  { %v1242_v17 = vpack.c.bf16 %v1034_v11, %v1031_v10 }
 0x5b7   :  { %v1237_v23 = vpack.c.bf16 %v1026_v16, %v1023_v13 }
 0x5b8   :  { %1258 = vst [vmem:[%s1867_s8 + $0x28] sm:$0xff] %v1242_v17  }
 0x5b9   :  { %1257 = vst [vmem:[%s1867_s8 + $0x20] sm:$0xff] %v1237_v23   ;;  %v1547_v24 = vpop.f32.mrb[44].mxu1 }
 0x5ba   :  { %v1038_v25 = vpop.f32.mrb[45].mxu1  ;;  %v1047_v27 = vadd.f32 %v1547_v24, %v1181_v58 }
 0x5bb   :  { %v1548_v26 = vpop.f32.mrb[46].mxu1  ;;  %v1039_v30 = vadd.f32 %v1181_v58, %v1038_v25 }
 0x5bc   :  { %v1050_v28 = vadd.f32 %v1548_v26, %v1181_v58  ;;  %v1041_v29 = vpop.f32.mrb[47].mxu1 }
 0x5bd   :  { %v1042_v31 = vadd.f32 %v1181_v58, %v1041_v29 }
 0x5be   :  { %v1252_v32 = vpack.c.bf16 %v1050_v28, %v1047_v27 }
 0x5bf   :  { %v1247_v34 = vpack.c.bf16 %v1042_v31, %v1039_v30 }
 0x5c0   :  { %1260 = vst [vmem:[%s1867_s8 + $0x38] sm:$0xff] %v1252_v32  }
 0x5c1   :  { %1259 = vst [vmem:[%s1867_s8 + $0x30] sm:$0xff] %v1247_v34  }
 0x5c2   :  { %1137 = vsyncpa [#allocation3], 1 }
 0x5c3   :  { %1138 = vsyncpa [#allocation5], 1 }

</bundles_post_ra>
